<compile_context>
chip_gen: v7x
topology: tpu7x:2x2x1
jax: 0.10.0
libtpu: 0.0.40
codegen_flags: <defaults>
</compile_context>

<pallas_src>
import functools

import jax
import jax.numpy as jnp
from jax.experimental import pallas as pl
from jax.experimental.pallas import tpu as pltpu

_LANE = 128


def _round_up(x, m):
    return (x + m - 1) // m * m


# --------------------------------------------------------------------------
# Kernel
# --------------------------------------------------------------------------
def _ppo_fused_kernel(x_ref, w1_ref, b1_ref, w2_ref, b2_ref, w3_ref, b3_ref,
                      out_ref, *, action_dim):
    """One batch tile: fused actor+critic MLP, lane-packed output slab."""
    wdt = w1_ref.dtype  # bf16 weight storage; MXU operands cast to match
    x = x_ref[...]

    # layer 1 (actor || critic concatenated on the output axis)
    h = jnp.dot(x.astype(wdt), w1_ref[...],
                preferred_element_type=jnp.float32) + b1_ref[...]
    h = jnp.tanh(h)
    # layer 2 (block-diagonal: actor block, critic block)
    z = jnp.dot(h.astype(wdt), w2_ref[...],
                preferred_element_type=jnp.float32) + b2_ref[...]
    z = jnp.tanh(z)
    # layer 3: lanes [0, action_dim) = actor logits, lane action_dim = value
    o = jnp.dot(z.astype(wdt), w3_ref[...],
                preferred_element_type=jnp.float32) + b3_ref[...]

    lane = jax.lax.broadcasted_iota(jnp.int32, o.shape, dimension=1)
    is_logit = lane < action_dim

    # numerically-stable softmax over the real action lanes only
    logits = jnp.where(is_logit, o, jnp.float32(-1e30))
    m = jnp.max(logits, axis=-1, keepdims=True)
    e = jnp.exp(logits - m)
    denom = jnp.sum(e, axis=-1, keepdims=True)
    probs = e * pl.reciprocal(denom, approx=True)

    out = jnp.where(is_logit, probs,
                    jnp.where(lane == action_dim, o, jnp.float32(0.0)))
    out_ref[...] = out.astype(out_ref.dtype)


# --------------------------------------------------------------------------
# Wrapper
# --------------------------------------------------------------------------
def ppo_forward(x, packed, *, max_tile_b=512):
    """x: [B, state_dim] f32.  Returns (probs [B, action_dim], value [B, 1])."""
    B, S = x.shape
    action_dim = packed["action_dim"]
    out_w = packed["w3"].shape[1]

    # Batch tile: full batch for small B, else stream max_tile_b-row tiles.
    tile_b = B if B <= max_tile_b else max_tile_b
    b_pad = _round_up(B, tile_b)
    if b_pad != B:
        x = jnp.pad(x, ((0, b_pad - B), (0, 0)))
    grid = (b_pad // tile_b,)

    # x / output tiles move with the batch block; weights stay VMEM-resident.
    x_spec = pl.BlockSpec((tile_b, S), lambda i: (i, 0))
    w1_spec = pl.BlockSpec(packed["w1"].shape, lambda i: (0, 0))
    b1_spec = pl.BlockSpec(packed["b1"].shape, lambda i: (0, 0))
    w2_spec = pl.BlockSpec(packed["w2"].shape, lambda i: (0, 0))
    b2_spec = pl.BlockSpec(packed["b2"].shape, lambda i: (0, 0))
    w3_spec = pl.BlockSpec(packed["w3"].shape, lambda i: (0, 0))
    b3_spec = pl.BlockSpec(packed["b3"].shape, lambda i: (0, 0))
    out_spec = pl.BlockSpec((tile_b, out_w), lambda i: (i, 0))

    kernel = functools.partial(_ppo_fused_kernel, action_dim=action_dim)

    out = pl.pallas_call(
        kernel,
        out_shape=jax.ShapeDtypeStruct((b_pad, out_w), jnp.float32),
        grid=grid,
        in_specs=[x_spec, w1_spec, b1_spec, w2_spec, b2_spec, w3_spec, b3_spec],
        out_specs=out_spec,
        compiler_params=pltpu.CompilerParams(
            dimension_semantics=("parallel",),       # shards tiles across TCs (v7x)
            vmem_limit_bytes=64 * 1024 * 1024,       # headroom for larger tiles / hidden
        ),
    )(x, packed["w1"], packed["b1"], packed["w2"], packed["b2"],
      packed["w3"], packed["b3"])

    probs = out[:B, :action_dim]
    value = out[:B, action_dim:action_dim + 1]
    return probs, value


# --------------------------------------------------------------------------
# Parameter init (mirrors torch.nn.Linear default init) and fused packing
# --------------------------------------------------------------------------
def init_ppo_params(key, state_dim, action_dim, hidden_size):
    def linear(k, fan_in, fan_out):
        kw, kb = jax.random.split(k)
        bound = 1.0 / jnp.sqrt(fan_in)
        w = jax.random.uniform(kw, (fan_in, fan_out), jnp.float32, -bound, bound)
        b = jax.random.uniform(kb, (1, fan_out), jnp.float32, -bound, bound)
        return w, b

    keys = jax.random.split(key, 6)
    aw1, ab1 = linear(keys[0], state_dim, hidden_size)
    aw2, ab2 = linear(keys[1], hidden_size, hidden_size)
    aw3, ab3 = linear(keys[2], hidden_size, action_dim)
    cw1, cb1 = linear(keys[3], state_dim, hidden_size)
    cw2, cb2 = linear(keys[4], hidden_size, hidden_size)
    cw3, cb3 = linear(keys[5], hidden_size, 1)
    return dict(aw1=aw1, ab1=ab1, aw2=aw2, ab2=ab2, aw3=aw3, ab3=ab3,
                cw1=cw1, cb1=cb1, cw2=cw2, cb2=cb2, cw3=cw3, cb3=cb3)


def pack_ppo_params(p, state_dim, action_dim, hidden_size,
                    weight_dtype=jnp.bfloat16):
    """Fuse actor+critic into lane-padded (128-multiple) bf16 weight blocks."""
    assert action_dim + 1 <= _LANE, "packed output slab assumes action_dim+1 <= 128"
    H = hidden_size
    HP = _round_up(H, _LANE)          # per-network padded hidden width
    out_w = _LANE                     # single lane-dense output slab

    # layer 1: [S, 2*HP], actor columns then critic columns (zero padded)
    w1 = jnp.zeros((state_dim, 2 * HP), jnp.float32)
    w1 = w1.at[:, :H].set(p["aw1"]).at[:, HP:HP + H].set(p["cw1"])
    b1 = jnp.zeros((1, 2 * HP), jnp.float32)
    b1 = b1.at[:, :H].set(p["ab1"]).at[:, HP:HP + H].set(p["cb1"])

    # layer 2: block-diagonal [2*HP, 2*HP]
    w2 = jnp.zeros((2 * HP, 2 * HP), jnp.float32)
    w2 = w2.at[:H, :H].set(p["aw2"]).at[HP:HP + H, HP:HP + H].set(p["cw2"])
    b2 = jnp.zeros((1, 2 * HP), jnp.float32)
    b2 = b2.at[:, :H].set(p["ab2"]).at[:, HP:HP + H].set(p["cb2"])

    # layer 3: [2*HP, 128] — actor logits in lanes [0, A), value in lane A
    w3 = jnp.zeros((2 * HP, out_w), jnp.float32)
    w3 = w3.at[:H, :action_dim].set(p["aw3"])
    w3 = w3.at[HP:HP + H, action_dim:action_dim + 1].set(p["cw3"])
    b3 = jnp.zeros((1, out_w), jnp.float32)
    b3 = b3.at[:, :action_dim].set(p["ab3"]).at[:, action_dim].set(p["cb3"][0, 0])

    return dict(
        w1=w1.astype(weight_dtype), b1=b1,
        w2=w2.astype(weight_dtype), b2=b2,
        w3=w3.astype(weight_dtype), b3=b3,
        action_dim=action_dim,
    )


# --------------------------------------------------------------------------
# References
# --------------------------------------------------------------------------
def ppo_forward_ref_f32(x, p):
    """Exact f32 PyTorch-semantics reference (unfused, unpadded)."""
    h = jnp.tanh(x @ p["aw1"] + p["ab1"])
    h = jnp.tanh(h @ p["aw2"] + p["ab2"])
    probs = jax.nn.softmax(h @ p["aw3"] + p["ab3"], axis=-1)
    g = jnp.tanh(x @ p["cw1"] + p["cb1"])
    g = jnp.tanh(g @ p["cw2"] + p["cb2"])
    v = g @ p["cw3"] + p["cb3"]
    return probs, v


def ppo_forward_ref_matched(x, packed):
    """Pure-JAX reference with the same fused/padded bf16 numerics as the kernel."""
    wdt = packed["w1"].dtype
    a = packed["action_dim"]
    h = jnp.tanh(jnp.dot(x.astype(wdt), packed["w1"],
                         preferred_element_type=jnp.float32) + packed["b1"])
    z = jnp.tanh(jnp.dot(h.astype(wdt), packed["w2"],
                         preferred_element_type=jnp.float32) + packed["b2"])
    o = jnp.dot(z.astype(wdt), packed["w3"],
                preferred_element_type=jnp.float32) + packed["b3"]
    probs = jax.nn.softmax(o[:, :a], axis=-1)
    value = o[:, a:a + 1]
    return probs, value


# --------------------------------------------------------------------------
if __name__ == "__main__":
    state_dim, action_dim, hidden_size = 16, 4, 32
    batch = 8

    key = jax.random.PRNGKey(0)
    kx, kp = jax.random.split(key)
    x = jax.random.normal(kx, (batch, state_dim), dtype=jnp.float32)
    params = init_ppo_params(kp, state_dim, action_dim, hidden_size)
    packed = pack_ppo_params(params, state_dim, action_dim, hidden_size)

    probs, value = ppo_forward(x, packed)
    probs = jax.block_until_ready(probs)
    value = jax.block_until_ready(value)

    assert probs.shape == (batch, action_dim)
    assert value.shape == (batch, 1)

    # tight check against a reference that uses the same bf16/fused numerics
    probs_m, value_m = ppo_forward_ref_matched(x, packed)
    assert jnp.allclose(probs, probs_m, atol=5e-3), "probs vs matched ref"
    assert jnp.allclose(value, value_m, atol=1e-3, rtol=1e-3), "value vs matched ref"

    # loose check against the exact f32 PyTorch-semantics reference
    probs_f, value_f = ppo_forward_ref_f32(x, params)
    assert jnp.allclose(probs, probs_f, atol=5e-2), "probs vs f32 ref"
    assert jnp.allclose(value, value_f, atol=5e-2), "value vs f32 ref"
    assert jnp.allclose(jnp.sum(probs, axis=-1), 1.0, atol=5e-3), "probs sum to 1"

    # exercise the tiled/pipelined path with a realistic rollout batch
    big_b = 2048
    xb = jax.random.normal(jax.random.PRNGKey(1), (big_b, state_dim),
                           dtype=jnp.float32)
    pb, vb = ppo_forward(xb, packed)
    pb = jax.block_until_ready(pb)
    vb = jax.block_until_ready(vb)
    assert pb.shape == (big_b, action_dim) and vb.shape == (big_b, 1)
    pbm, vbm = ppo_forward_ref_matched(xb, packed)
    assert jnp.allclose(pb, pbm, atol=5e-3), "big-batch probs vs matched ref"
    assert jnp.allclose(vb, vbm, atol=1e-3, rtol=1e-3), "big-batch value vs matched ref"

    # non-multiple-of-tile batch (pads to the tile, then slices back)
    odd_b = 700
    xo = jax.random.normal(jax.random.PRNGKey(2), (odd_b, state_dim),
                           dtype=jnp.float32)
    po, vo = ppo_forward(xo, packed)
    po = jax.block_until_ready(po)
    assert po.shape == (odd_b, action_dim) and vo.shape == (odd_b, 1)
    pom, vom = ppo_forward_ref_matched(xo, packed)
    assert jnp.allclose(po, pom, atol=5e-3), "odd-batch probs vs matched ref"
    assert jnp.allclose(vo, vom, atol=1e-3, rtol=1e-3), "odd-batch value vs matched ref"

    print("KERNEL_OK")
</pallas_src>

<mosaic_0001>
module attributes {stable_mosaic.version = 11 : i64} {
  func.func @_ppo_fused_kernel(%arg0: i32, %arg1: memref<8x16xf32, #tpu.memory_space<vmem>>, %arg2: memref<16x256xbf16, #tpu.memory_space<vmem>>, %arg3: memref<1x256xf32, #tpu.memory_space<vmem>>, %arg4: memref<256x256xbf16, #tpu.memory_space<vmem>>, %arg5: memref<1x256xf32, #tpu.memory_space<vmem>>, %arg6: memref<256x128xbf16, #tpu.memory_space<vmem>>, %arg7: memref<1x128xf32, #tpu.memory_space<vmem>>, %arg8: memref<8x128xf32, #tpu.memory_space<vmem>>) attributes {dimension_semantics = [#tpu.dimension_semantics<parallel>], iteration_bounds = array<i64: 1>, scalar_prefetch = 0 : i64, scratch_operands = 0 : i64, tpu.core_type = #tpu.core_type<tc>, window_params = [{transform_indices = @transform_0, window_bounds = array<i64: 8, 16>}, {pipeline_mode = #tpu.pipeline_mode<synchronous>, transform_indices = @transform_1, window_bounds = array<i64: 16, 256>}, {pipeline_mode = #tpu.pipeline_mode<synchronous>, transform_indices = @transform_2, window_bounds = array<i64: 1, 256>}, {pipeline_mode = #tpu.pipeline_mode<synchronous>, transform_indices = @transform_3, window_bounds = array<i64: 256, 256>}, {pipeline_mode = #tpu.pipeline_mode<synchronous>, transform_indices = @transform_4, window_bounds = array<i64: 1, 256>}, {pipeline_mode = #tpu.pipeline_mode<synchronous>, transform_indices = @transform_5, window_bounds = array<i64: 256, 128>}, {pipeline_mode = #tpu.pipeline_mode<synchronous>, transform_indices = @transform_6, window_bounds = array<i64: 1, 128>}, {transform_indices = @transform_7, window_bounds = array<i64: 8, 128>}]} {
    %c0 = arith.constant 0 : index
    %c0_0 = arith.constant 0 : index
    %0 = vector.load %arg1[%c0, %c0_0] : memref<8x16xf32, #tpu.memory_space<vmem>>, vector<8x16xf32>
    %1 = arith.truncf %0 : vector<8x16xf32> to vector<8x16xbf16>
    %c0_1 = arith.constant 0 : index
    %c0_2 = arith.constant 0 : index
    %2 = vector.load %arg2[%c0_1, %c0_2] : memref<16x256xbf16, #tpu.memory_space<vmem>>, vector<16x256xbf16>
    %cst = arith.constant dense<0.000000e+00> : vector<8x256xf32>
    %3 = tpu.matmul %1, %2, %cst {dimension_numbers = #tpu.dot_dimension_numbers<[1], [0], [0], [1], [0, 0, 1, 1], [], []>} : vector<8x16xbf16>, vector<16x256xbf16>, vector<8x256xf32> -> vector<8x256xf32>
    %c0_3 = arith.constant 0 : index
    %c0_4 = arith.constant 0 : index
    %4 = vector.load %arg3[%c0_3, %c0_4] : memref<1x256xf32, #tpu.memory_space<vmem>>, vector<1x256xf32>
    %5 = vector.broadcast %4 : vector<1x256xf32> to vector<8x256xf32>
    %6 = arith.addf %3, %5 : vector<8x256xf32>
    %7 = math.tanh %6 : vector<8x256xf32>
    %8 = arith.truncf %7 : vector<8x256xf32> to vector<8x256xbf16>
    %c0_5 = arith.constant 0 : index
    %c0_6 = arith.constant 0 : index
    %9 = vector.load %arg4[%c0_5, %c0_6] : memref<256x256xbf16, #tpu.memory_space<vmem>>, vector<256x256xbf16>
    %cst_7 = arith.constant dense<0.000000e+00> : vector<8x256xf32>
    %10 = tpu.matmul %8, %9, %cst_7 {dimension_numbers = #tpu.dot_dimension_numbers<[1], [0], [0], [1], [0, 0, 1, 1], [], []>} : vector<8x256xbf16>, vector<256x256xbf16>, vector<8x256xf32> -> vector<8x256xf32>
    %c0_8 = arith.constant 0 : index
    %c0_9 = arith.constant 0 : index
    %11 = vector.load %arg5[%c0_8, %c0_9] : memref<1x256xf32, #tpu.memory_space<vmem>>, vector<1x256xf32>
    %12 = vector.broadcast %11 : vector<1x256xf32> to vector<8x256xf32>
    %13 = arith.addf %10, %12 : vector<8x256xf32>
    %14 = math.tanh %13 : vector<8x256xf32>
    %15 = arith.truncf %14 : vector<8x256xf32> to vector<8x256xbf16>
    %c0_10 = arith.constant 0 : index
    %c0_11 = arith.constant 0 : index
    %16 = vector.load %arg6[%c0_10, %c0_11] : memref<256x128xbf16, #tpu.memory_space<vmem>>, vector<256x128xbf16>
    %cst_12 = arith.constant dense<0.000000e+00> : vector<8x128xf32>
    %17 = tpu.matmul %15, %16, %cst_12 {dimension_numbers = #tpu.dot_dimension_numbers<[1], [0], [0], [1], [0, 0, 1, 1], [], []>} : vector<8x256xbf16>, vector<256x128xbf16>, vector<8x128xf32> -> vector<8x128xf32>
    %c0_13 = arith.constant 0 : index
    %c0_14 = arith.constant 0 : index
    %18 = vector.load %arg7[%c0_13, %c0_14] : memref<1x128xf32, #tpu.memory_space<vmem>>, vector<1x128xf32>
    %19 = vector.broadcast %18 : vector<1x128xf32> to vector<8x128xf32>
    %20 = arith.addf %17, %19 : vector<8x128xf32>
    %21 = tpu.iota {dimensions = array<i32: 1>} : vector<8x128xi32>
    %c4_i32 = arith.constant 4 : i32
    %22 = vector.broadcast %c4_i32 : i32 to vector<8x128xi32>
    %23 = arith.cmpi slt, %21, %22 : vector<8x128xi32>
    %cst_15 = arith.constant -1.000000e+30 : f32
    %24 = vector.broadcast %cst_15 : f32 to vector<8x128xf32>
    %25 = arith.select %23, %20, %24 : vector<8x128xi1>, vector<8x128xf32>
    %cst_16 = arith.constant dense<0xFF800000> : vector<8xf32>
    %26 = vector.multi_reduction <maximumf>, %25, %cst_16 [1] : vector<8x128xf32> to vector<8xf32>
    %27 = vector.shape_cast %26 : vector<8xf32> to vector<8x1xf32>
    %28 = vector.broadcast %27 : vector<8x1xf32> to vector<8x128xf32>
    %29 = arith.subf %25, %28 : vector<8x128xf32>
    %30 = math.exp %29 : vector<8x128xf32>
    %cst_17 = arith.constant dense<0.000000e+00> : vector<8xf32>
    %31 = vector.multi_reduction <add>, %30, %cst_17 [1] : vector<8x128xf32> to vector<8xf32>
    %32 = vector.shape_cast %31 : vector<8xf32> to vector<8x1xf32>
    %33 = tpu.reciprocal %32 {approx = true} : vector<8x1xf32> -> vector<8x1xf32>
    %34 = vector.broadcast %33 : vector<8x1xf32> to vector<8x128xf32>
    %35 = arith.mulf %30, %34 : vector<8x128xf32>
    %c4_i32_18 = arith.constant 4 : i32
    %36 = vector.broadcast %c4_i32_18 : i32 to vector<8x128xi32>
    %37 = arith.cmpi eq, %21, %36 : vector<8x128xi32>
    %cst_19 = arith.constant 0.000000e+00 : f32
    %38 = vector.broadcast %cst_19 : f32 to vector<8x128xf32>
    %39 = arith.select %37, %20, %38 : vector<8x128xi1>, vector<8x128xf32>
    %40 = arith.select %23, %35, %39 : vector<8x128xi1>, vector<8x128xf32>
    %c0_20 = arith.constant 0 : index
    %c0_21 = arith.constant 0 : index
    %41 = vector.load %arg8[%c0_20, %c0_21] : memref<8x128xf32, #tpu.memory_space<vmem>>, vector<8x128xf32>
    tpu.vector_store %arg8[%c0_20, %c0_21], %40 {strides = array<i32>} : memref<8x128xf32, #tpu.memory_space<vmem>>, vector<8x128xf32>,
    return
  }
  func.func @transform_0(%arg0: i32) -> (i32, i32) {
    %c0_i32 = arith.constant 0 : i32
    %c0_i32_0 = arith.constant 0 : i32
    return %arg0, %c0_i32 : i32, i32
  }
  func.func @transform_1(%arg0: i32) -> (i32, i32) {
    %c0_i32 = arith.constant 0 : i32
    %c0_i32_0 = arith.constant 0 : i32
    %c0_i32_1 = arith.constant 0 : i32
    return %c0_i32, %c0_i32_0 : i32, i32
  }
  func.func @transform_2(%arg0: i32) -> (i32, i32) {
    %c0_i32 = arith.constant 0 : i32
    %c0_i32_0 = arith.constant 0 : i32
    %c0_i32_1 = arith.constant 0 : i32
    return %c0_i32, %c0_i32_0 : i32, i32
  }
  func.func @transform_3(%arg0: i32) -> (i32, i32) {
    %c0_i32 = arith.constant 0 : i32
    %c0_i32_0 = arith.constant 0 : i32
    %c0_i32_1 = arith.constant 0 : i32
    return %c0_i32, %c0_i32_0 : i32, i32
  }
  func.func @transform_4(%arg0: i32) -> (i32, i32) {
    %c0_i32 = arith.constant 0 : i32
    %c0_i32_0 = arith.constant 0 : i32
    %c0_i32_1 = arith.constant 0 : i32
    return %c0_i32, %c0_i32_0 : i32, i32
  }
  func.func @transform_5(%arg0: i32) -> (i32, i32) {
    %c0_i32 = arith.constant 0 : i32
    %c0_i32_0 = arith.constant 0 : i32
    %c0_i32_1 = arith.constant 0 : i32
    return %c0_i32, %c0_i32_0 : i32, i32
  }
  func.func @transform_6(%arg0: i32) -> (i32, i32) {
    %c0_i32 = arith.constant 0 : i32
    %c0_i32_0 = arith.constant 0 : i32
    %c0_i32_1 = arith.constant 0 : i32
    return %c0_i32, %c0_i32_0 : i32, i32
  }
  func.func @transform_7(%arg0: i32) -> (i32, i32) {
    %c0_i32 = arith.constant 0 : i32
    %c0_i32_0 = arith.constant 0 : i32
    return %arg0, %c0_i32 : i32, i32
  }
}

</mosaic_0001>

<bundles_post_ra>
// kernel: tpu_custom_call.1
= control target key start
LH: loop header
LB: loop body
LE: loop exit
PB: predicated region body
PF: predicated region fallthrough
CT: control target
= control target key end

     0   :  { %12 = vsyncpa [#allocation3], 0  ;;  %s1152_s0 = inlined_call_operand.hbm [shape: f32[8,16], index: 0, kind: input, shape index: {}]   ;;  %s1153_s1 = inlined_call_operand.hbm [shape: bf16[16,256], index: 1, kind: input, shape index: {}]   ;;  %s1154_s2 = inlined_call_operand.hbm [shape: f32[1,256], index: 2, kind: input, shape index: {}]   ;;  %s1155_s3 = inlined_call_operand.hbm [shape: bf16[256,256], index: 3, kind: input, shape index: {}]   ;;  %s1156_s4 = inlined_call_operand.hbm [shape: f32[1,256], index: 4, kind: input, shape index: {}]   ;;  %s1157_s5 = inlined_call_operand.hbm [shape: bf16[256,128], index: 5, kind: input, shape index: {}]   ;;  %s1158_s6 = inlined_call_operand.hbm [shape: f32[1,128], index: 6, kind: input, shape index: {}]   ;;  %s1159_s7 = inlined_call_operand.hbm [shape: f32[8,128], index: 7, kind: output, shape index: {}]  }
   0x1   :  { %13 = vsyncpa [#allocation6], 0 }
   0x2   :  { %14 = vsyncpa [#allocation9], 0 }
   0x3   :  { %15 = vsyncpa [#allocation12], 0 }
   0x4   :  { %16 = vsyncpa [#allocation4], 0  ;;  %s1001_s24 = smov [#allocation5]   ;;  %s815_s28 = scalar_lea.hbm %s1153_s1, 256 }
   0x5   :  { %s32_s25 = sshll.u32 %s1001_s24, 4  ;;  %p816_p0 = scmp.ne.s32.totalorder %s1153_s1, %s815_s28  ;;  %s33_s25 = int_to_ptr.vmem [resolvable:$true] %s32_s25 }
   0x6   :  { %p819_p1 = scmp.lt.u32.totalorder %s815_s28, %s1153_s1 }
   0x8   :  { %p821_p2 = pnand %p819_p1, %p816_p0 }
   0xa   :  { %824 = shalt.err (!%p821_p2)
}
   0xb   :  { %s825_s10 = scalar_lea.vmem %s33_s25, 256  ;;  %p830_p4 = scmp.lt.s32.totalorder %s33_s25, %s33_s25 }
   0xc   :  { %p826_p3 = scmp.ne.s32.totalorder %s33_s25, %s825_s10  ;;  %p831_p5 = scmp.lt.s32.totalorder %s825_s10, %s825_s10 }
   0xe   :  { %p832_p6 = por %p831_p5, %p830_p4 }
  0x10   :  { %p833_p7 = pnand %p832_p6, %p826_p3 }
  0x12   :  { %836 = shalt.err (!%p833_p7)
}
  0x13   :  { %s1002_s11 = smov 128   ;;  %s1003_s12 = smov 8  }
  0x14   :  { %38 = dma.hbm_to_vmem [thread:$0]  %s1153_s1, 256, %s33_s25, [#allocation6], %s1002_s11, %s1002_s11, %s1003_s12  }
  0x15   :  { %s1004_s15 = smov [#allocation8]   ;;  %s1005_s17 = smov [#allocation11]  }
  0x16   :  { %s54_s16 = sshll.u32 %s1004_s15, 4  ;;  %s76_s18 = sshll.u32 %s1005_s17, 4  ;;  %s55_s16 = int_to_ptr.vmem [resolvable:$true] %s54_s16  ;;  %s77_s18 = int_to_ptr.vmem [resolvable:$true] %s76_s18 }
  0x17   :  { %s837_s21 = scalar_lea.hbm %s1155_s3, 4096 }
  0x18   :  { %p838_p8 = scmp.ne.s32.totalorder %s1155_s3, %s837_s21  ;;  %p841_p9 = scmp.lt.u32.totalorder %s837_s21, %s1155_s3 }
  0x1a   :  { %p843_p10 = pnand %p841_p9, %p838_p8 }
  0x1c   :  { %846 = shalt.err (!%p843_p10)
}
  0x1d   :  { %s847_s1 = scalar_lea.vmem %s55_s16, 4096  ;;  %p852_p12 = scmp.lt.s32.totalorder %s55_s16, %s55_s16 }
  0x1e   :  { %p848_p11 = scmp.ne.s32.totalorder %s55_s16, %s847_s1  ;;  %p853_p13 = scmp.lt.s32.totalorder %s847_s1, %s847_s1 }
  0x20   :  { %p854_p0 = por %p853_p13, %p852_p12 }
  0x22   :  { %p855_p1 = pnand %p854_p0, %p848_p11 }
  0x24   :  { %858 = shalt.err (!%p855_p1)
}
  0x25   :  { %60 = dma.hbm_to_vmem [thread:$0]  %s1155_s3, 4096, %s55_s16, [#allocation9], %s1002_s11, %s1002_s11, %s1003_s12  }
  0x26   :  { %s859_s30 = scalar_lea.hbm %s1157_s5, 2048 }
  0x27   :  { %p860_p2 = scmp.ne.s32.totalorder %s1157_s5, %s859_s30  ;;  %p863_p3 = scmp.lt.u32.totalorder %s859_s30, %s1157_s5 }
  0x29   :  { %p865_p4 = pnand %p863_p3, %p860_p2 }
  0x2b   :  { %868 = shalt.err (!%p865_p4)
}
  0x2c   :  { %s869_s14 = scalar_lea.vmem %s77_s18, 2048  ;;  %p874_p6 = scmp.lt.s32.totalorder %s77_s18, %s77_s18 }
  0x2d   :  { %p870_p5 = scmp.ne.s32.totalorder %s77_s18, %s869_s14  ;;  %p875_p7 = scmp.lt.s32.totalorder %s869_s14, %s869_s14 }
  0x2f   :  { %p876_p8 = por %p875_p7, %p874_p6 }
  0x31   :  { %p877_p9 = pnand %p876_p8, %p870_p5 }
  0x33   :  { %880 = shalt.err (!%p877_p9)
}
  0x34   :  { %s1006_s3 = smov 64   ;;  %s1007_s11 = smov 4  }
  0x35   :  { %82 = dma.hbm_to_vmem [thread:$0]  %s1157_s5, 2048, %s77_s18, [#allocation12], %s1006_s3, %s1006_s3, %s1007_s11  }
  0x36   :  { %s1008_s16 = smov [#allocation2]   ;;  %s1009_s19 = smov [#allocation7]  }
  0x37   :  { %s23_s17 = sshll.u32 %s1008_s16, 4  ;;  %s45_s20 = sshll.u32 %s1009_s19, 4  ;;  %s24_s17 = int_to_ptr.vmem [resolvable:$true] %s23_s17  ;;  %s46_s20 = int_to_ptr.vmem [resolvable:$true] %s45_s20 }
  0x38   :  { %s881_s23 = scalar_lea.hbm %s1152_s0, 128 }
  0x39   :  { %p882_p10 = scmp.ne.s32.totalorder %s1152_s0, %s881_s23  ;;  %p885_p11 = scmp.lt.u32.totalorder %s881_s23, %s1152_s0 }
  0x3b   :  { %p887_p12 = pnand %p885_p11, %p882_p10 }
  0x3d   :  { %890 = shalt.err (!%p887_p12)
}
  0x3e   :  { %s891_s5 = scalar_lea.vmem %s24_s17, 128  ;;  %p896_p0 = scmp.lt.s32.totalorder %s24_s17, %s24_s17 }
  0x3f   :  { %p892_p13 = scmp.ne.s32.totalorder %s24_s17, %s891_s5  ;;  %p897_p1 = scmp.lt.s32.totalorder %s891_s5, %s891_s5 }
  0x41   :  { %p898_p2 = por %p897_p1, %p896_p0 }
  0x43   :  { %p899_p3 = pnand %p898_p2, %p892_p13 }
  0x45   :  { %902 = shalt.err (!%p899_p3)
}
  0x46   :  { %26 = dma.hbm_to_vmem [thread:$0]  %s1152_s0, 128, %s24_s17, [#allocation3]  }
  0x47   :  { %s903_s30 = scalar_lea.hbm %s1154_s2, 32 }
  0x48   :  { %p904_p4 = scmp.ne.s32.totalorder %s1154_s2, %s903_s30  ;;  %p907_p5 = scmp.lt.u32.totalorder %s903_s30, %s1154_s2 }
  0x4a   :  { %p909_p6 = pnand %p907_p5, %p904_p4 }
  0x4c   :  { %912 = shalt.err (!%p909_p6)
}
  0x4d   :  { %s913_s14 = scalar_lea.vmem %s46_s20, 32  ;;  %p918_p8 = scmp.lt.s32.totalorder %s46_s20, %s46_s20 }
  0x4e   :  { %p914_p7 = scmp.ne.s32.totalorder %s46_s20, %s913_s14  ;;  %p919_p9 = scmp.lt.s32.totalorder %s913_s14, %s913_s14 }
  0x50   :  { %p920_p10 = por %p919_p9, %p918_p8 }
  0x52   :  { %p921_p11 = pnand %p920_p10, %p914_p7 }
  0x54   :  { %924 = shalt.err (!%p921_p11)
}
  0x55   :  { %48 = dma.hbm_to_vmem [thread:$0]  %s1154_s2, 32, %s46_s20, [#allocation6]  }
  0x56   :  { %s1010_s11 = smov [#allocation10]   ;;  %s1011_s15 = smov [#allocation13]  }
  0x57   :  { %s67_s12 = sshll.u32 %s1010_s11, 4  ;;  %s89_s16 = sshll.u32 %s1011_s15, 4  ;;  %s68_s12 = int_to_ptr.vmem [resolvable:$true] %s67_s12  ;;  %s90_s16 = int_to_ptr.vmem [resolvable:$true] %s89_s16 }
  0x58   :  { %s925_s21 = scalar_lea.hbm %s1156_s4, 32 }
  0x59   :  { %p926_p12 = scmp.ne.s32.totalorder %s1156_s4, %s925_s21  ;;  %p929_p13 = scmp.lt.u32.totalorder %s925_s21, %s1156_s4 }
  0x5b   :  { %p931_p0 = pnand %p929_p13, %p926_p12 }
  0x5d   :  { %934 = shalt.err (!%p931_p0)
}
  0x5e   :  { %s935_s2 = scalar_lea.vmem %s68_s12, 32  ;;  %p940_p2 = scmp.lt.s32.totalorder %s68_s12, %s68_s12 }
  0x5f   :  { %p936_p1 = scmp.ne.s32.totalorder %s68_s12, %s935_s2  ;;  %p941_p3 = scmp.lt.s32.totalorder %s935_s2, %s935_s2 }
  0x61   :  { %p942_p4 = por %p941_p3, %p940_p2 }
  0x63   :  { %p943_p5 = pnand %p942_p4, %p936_p1 }
  0x65   :  { %946 = shalt.err (!%p943_p5)
}
  0x66   :  { %70 = dma.hbm_to_vmem [thread:$0]  %s1156_s4, 32, %s68_s12, [#allocation9]  }
  0x67   :  { %s947_s18 = scalar_lea.hbm %s1158_s6, 16 }
  0x68   :  { %p948_p6 = scmp.ne.s32.totalorder %s1158_s6, %s947_s18  ;;  %p951_p7 = scmp.lt.u32.totalorder %s947_s18, %s1158_s6 }
  0x6a   :  { %p953_p8 = pnand %p951_p7, %p948_p6 }
  0x6c   :  { %956 = shalt.err (!%p953_p8)
}
  0x6d   :  { %s957_s8 = scalar_lea.vmem %s90_s16, 16  ;;  %s961_s9 = scalar_lea.vmem %s90_s16, 32 }
  0x6e   :  { %p958_p9 = scmp.ne.s32.totalorder %s90_s16, %s957_s8  ;;  %p962_p10 = scmp.lt.s32.totalorder %s90_s16, %s90_s16 }
  0x6f   :  { %p963_p11 = scmp.lt.s32.totalorder %s961_s9, %s957_s8 }
  0x71   :  { %p964_p12 = por %p963_p11, %p962_p10 }
  0x73   :  { %p965_p13 = pnand %p964_p12, %p958_p9 }
  0x75   :  { %968 = shalt.err (!%p965_p13)
}
  0x76   :  { %92 = dma.hbm_to_vmem [thread:$0]  %s1158_s6, 16, %s90_s16, [#allocation12]  }
  0x77   :  { %991 = dma.done.wait [#allocation3], 128  }
  0x78   :  { %992 = vsyncadd [#allocation3], 4294967168 }
  0x79   :  { %993 = dma.done.wait [#allocation6], 288  }
  0x7a   :  { %994 = vsyncadd [#allocation6], 4294967008 }
  0x7b   :  { %995 = dma.done.wait [#allocation9], 4128  }
  0x7c   :  { %996 = vsyncadd [#allocation9], 4294963168 }
  0x7d   :  { %997 = dma.done.wait [#allocation12], 2064  }
  0x7e   :  { %998 = vsyncadd [#allocation12], 4294965232  ;;  %v1012_v0 = vmov 0   ;;  %v736_v1 = vld [vmem:[#allocation5 + $0x4] ss:$8 sps:$4 sm:$0xff]   ;;  %v115_v3 = vld [vmem:[#allocation2] sm:$0xff]  ;;  %v121_v45 = vlaneseq }
  0x7f   :  { %177 = vmatprep.mubr.bf16.mxu0 %v1012_v0  ;;  %v738_v2 = vld [vmem:[#allocation5] ss:$8 sps:$4 sm:$0xff]   ;;  %145 = vmatprep.subr.bf16.mxu0 %v736_v1  ;;  %v116_v4 = vpack.c.bf16 %v115_v3, %v115_v3  ;;  %v741_v6 = vld [vmem:[#allocation8] ss:$8 sps:$4 sm:$0xff]   ;;  %vm141_vm0 = vcmask 130048   ;;  %s1013_s6 = smov [#allocation14]  }
  0x80   :  { %v739_v5 = vld [vmem:[#allocation8 + $0x4] ss:$8 sps:$4 sm:$0xff]   ;;  %146 = vmatpush1.bf16.msra.mxu0 %v738_v2  ;;  %v742_v7 = vld [vmem:[#allocation8 + $0x14] ss:$8 sps:$4 sm:$0xff]   ;;  %v744_v8 = vld [vmem:[#allocation8 + $0x10] ss:$8 sps:$4 sm:$0xff]  }
  0x81   :  { %394 = vmatprep.subr.bf16.mxu1 %v739_v5  ;;  %v745_v9 = vld [vmem:[#allocation8 + $0x24] ss:$8 sps:$4 sm:$0xff]   ;;  %v747_v10 = vld [vmem:[#allocation8 + $0x20] ss:$8 sps:$4 sm:$0xff]   ;;  %v748_v11 = vld [vmem:[#allocation8 + $0x34] ss:$8 sps:$4 sm:$0xff]  }
  0x82   :  { %395 = vmatpush1.bf16.msra.mxu1 %v741_v6  ;;  %v750_v12 = vld [vmem:[#allocation8 + $0x30] ss:$8 sps:$4 sm:$0xff]   ;;  %v751_v13 = vld [vmem:[#allocation8 + $0x44] ss:$8 sps:$4 sm:$0xff]   ;;  %v753_v14 = vld [vmem:[#allocation8 + $0x40] ss:$8 sps:$4 sm:$0xff]  }
  0x83   :  { %651 = vmatmul.mubr.msk.bf16.vlgmr.msra.gmra.mrb[0].mxu0 %vm141_vm0, %v116_v4  ;;  %396 = vmatprep.subr.bf16.mxu1 %v742_v7  ;;  %v754_v15 = vld [vmem:[#allocation8 + $0x54] ss:$8 sps:$4 sm:$0xff]   ;;  %v756_v16 = vld [vmem:[#allocation8 + $0x50] ss:$8 sps:$4 sm:$0xff]   ;;  %v757_v17 = vld [vmem:[#allocation8 + $0x64] ss:$8 sps:$4 sm:$0xff]  }
  0x84   :  { %v759_v18 = vld [vmem:[#allocation8 + $0x60] ss:$8 sps:$4 sm:$0xff]   ;;  %v760_v19 = vld [vmem:[#allocation8 + $0x74] ss:$8 sps:$4 sm:$0xff]   ;;  %v762_v20 = vld [vmem:[#allocation8 + $0x70] ss:$8 sps:$4 sm:$0xff]  }
  0x85   :  { %v763_v21 = vld [vmem:[#allocation8 + $0x84] ss:$8 sps:$4 sm:$0xff]   ;;  %v765_v22 = vld [vmem:[#allocation8 + $0x80] ss:$8 sps:$4 sm:$0xff]   ;;  %v766_v23 = vld [vmem:[#allocation8 + $0x94] ss:$8 sps:$4 sm:$0xff]  }
  0x86   :  { %397 = vmatpush1.bf16.msra.mxu1 %v744_v8  ;;  %v768_v24 = vld [vmem:[#allocation8 + $0x90] ss:$8 sps:$4 sm:$0xff]   ;;  %v769_v25 = vld [vmem:[#allocation8 + $0xa4] ss:$8 sps:$4 sm:$0xff]   ;;  %v771_v26 = vld [vmem:[#allocation8 + $0xa0] ss:$8 sps:$4 sm:$0xff]  }
  0x87   :  { %398 = vmatprep.subr.bf16.mxu1 %v745_v9  ;;  %v772_v27 = vld [vmem:[#allocation8 + $0xb4] ss:$8 sps:$4 sm:$0xff]   ;;  %v774_v28 = vld [vmem:[#allocation8 + $0xb0] ss:$8 sps:$4 sm:$0xff]   ;;  %v775_v29 = vld [vmem:[#allocation8 + $0xc4] ss:$8 sps:$4 sm:$0xff]  }
  0x88   :  { %v777_v30 = vld [vmem:[#allocation8 + $0xc0] ss:$8 sps:$4 sm:$0xff]   ;;  %v778_v31 = vld [vmem:[#allocation8 + $0xd4] ss:$8 sps:$4 sm:$0xff]   ;;  %v780_v32 = vld [vmem:[#allocation8 + $0xd0] ss:$8 sps:$4 sm:$0xff]  }
  0x89   :  { %v781_v33 = vld [vmem:[#allocation8 + $0xe4] ss:$8 sps:$4 sm:$0xff]   ;;  %v783_v34 = vld [vmem:[#allocation8 + $0xe0] ss:$8 sps:$4 sm:$0xff]   ;;  %v784_v35 = vld [vmem:[#allocation8 + $0xf4] ss:$8 sps:$4 sm:$0xff]  }
  0x8a   :  { %399 = vmatpush1.bf16.msra.mxu1 %v747_v10  ;;  %v786_v36 = vld [vmem:[#allocation8 + $0xf0] ss:$8 sps:$4 sm:$0xff]   ;;  %v787_v37 = vld [vmem:[#allocation11 + $0x40] sm:$0xff]   ;;  %v122_v46 = vshrl.u32 %v121_v45, 7  ;;  %v119_v48 = vld [vmem:[#allocation7] sm:$0x3] }
  0x8b   :  { %400 = vmatprep.subr.bf16.mxu1 %v748_v11  ;;  %v788_v38 = vld [vmem:[#allocation11] sm:$0xff]   ;;  %v789_v39 = vld [vmem:[#allocation11 + $0x48] sm:$0xff]   ;;  %701 = vmatprep.subr.bf16.mxu0 %v787_v37  ;;  %v791_v41 = vld [vmem:[#allocation11 + $0x50] sm:$0xff]   ;;  %s637_s13 = sshll.u32 %s1013_s6, 4  ;;  %s638_s13 = int_to_ptr.vmem [resolvable:$true] %s637_s13 }
  0x8c   :  { %702 = vmatpush3.bf16.msra.mxu0 %v788_v38  ;;  %v790_v40 = vld [vmem:[#allocation11 + $0x8] sm:$0xff]   ;;  %v792_v42 = vld [vmem:[#allocation11 + $0x10] sm:$0xff]   ;;  %v793_v43 = vld [vmem:[#allocation11 + $0x58] sm:$0xff]   ;;  %v123_v47 = vsub.s32 0, %v122_v46  ;;  %v127_v49 = vsub.s32 1, %v122_v46  ;;  %s969_s14 = scalar_lea.vmem %s638_s13, 128  ;;  %p974_p1 = scmp.lt.s32.totalorder %s638_s13, %s638_s13 }
  0x8d   :  { %703 = vmatprep.subr.bf16.mxu0 %v789_v39  ;;  %v794_v44 = vld [vmem:[#allocation11 + $0x18] sm:$0xff]   ;;  %v795_v62 = vld [vmem:[#allocation11 + $0x60] sm:$0xff]   ;;  %v797_v0 = vld [vmem:[#allocation11 + $0x68] sm:$0xff]   ;;  %p970_p0 = scmp.ne.s32.totalorder %s638_s13, %s969_s14  ;;  %p975_p2 = scmp.lt.s32.totalorder %s969_s14, %s969_s14 }
  0x8e   :  { %401 = vmatpush1.bf16.msra.mxu1 %v750_v12  ;;  %v124_v50 = vrot.slane %v119_v48, %v123_v47  ;;  %v128_v51 = vrot.slane %v119_v48, %v127_v49  ;;  %v796_v63 = vld [vmem:[#allocation11 + $0x20] sm:$0xff]   ;;  %v798_v1 = vld [vmem:[#allocation11 + $0x28] sm:$0xff]   ;;  %v799_v2 = vld [vmem:[#allocation11 + $0x70] sm:$0xff]  }
  0x8f   :  { %402 = vmatprep.subr.bf16.mxu1 %v751_v13  ;;  %v800_v3 = vld [vmem:[#allocation11 + $0x30] sm:$0xff]   ;;  %v801_v4 = vld [vmem:[#allocation11 + $0x78] sm:$0xff]   ;;  %p976_p3 = por %p975_p2, %p974_p1 }
  0x90   :  { %704 = vmatpush3.bf16.msra.mxu0 %v790_v40  ;;  %v802_v5 = vld [vmem:[#allocation11 + $0x38] sm:$0xff]  }
  0x91   :  { %705 = vmatprep.subr.bf16.mxu0 %v791_v41  ;;  %v222_v6 = vld [vmem:[#allocation10] sm:$0x3]  ;;  %p977_p4 = pnand %p976_p3, %p970_p0 }
  0x92   :  { %403 = vmatpush1.bf16.msra.mxu1 %v753_v14  ;;  %v227_v7 = vrot.slane %v222_v6, %v123_v47  ;;  %v231_v8 = vrot.slane %v222_v6, %v127_v49 }
  0x93   :  { %404 = vmatprep.subr.bf16.mxu1 %v754_v15 }
  0x94   :  { %706 = vmatpush3.bf16.msra.mxu0 %v792_v42 }
  0x95   :  { %707 = vmatprep.subr.bf16.mxu0 %v793_v43 }
  0x96   :  { %405 = vmatpush1.bf16.msra.mxu1 %v756_v16 }
  0x97   :  { %406 = vmatprep.subr.bf16.mxu1 %v757_v17 }
  0x98   :  { %708 = vmatpush3.bf16.msra.mxu0 %v794_v44 }
  0x99   :  { %709 = vmatprep.subr.bf16.mxu0 %v795_v62 }
  0x9a   :  { %407 = vmatpush1.bf16.msra.mxu1 %v759_v18 }
  0x9b   :  { %408 = vmatprep.subr.bf16.mxu1 %v760_v19  ;;  %v615_v19 = vand.u32 127, %v121_v45 }
  0x9c   :  { %710 = vmatpush3.bf16.msra.mxu0 %v796_v63 }
  0x9d   :  { %711 = vmatprep.subr.bf16.mxu0 %v797_v0  ;;  %vm616_vm1 = vcmp.lt.s32.totalorder %v615_v19, 4  ;;  %vm627_vm2 = vcmp.eq.s32.totalorder %v615_v19, 4 }
  0x9e   :  { %409 = vmatpush1.bf16.msra.mxu1 %v762_v20 }
  0x9f   :  { %410 = vmatprep.subr.bf16.mxu1 %v763_v21 }
  0xa0   :  { %712 = vmatpush3.bf16.msra.mxu0 %v798_v1 }
  0xa1   :  { %713 = vmatprep.subr.bf16.mxu0 %v799_v2 }
  0xa2   :  { %411 = vmatpush1.bf16.msra.mxu1 %v765_v22  ;;  %v684_v22 = vld [vmem:[#allocation13] ss:$0 sm:$0xff] }
  0xa3   :  { %412 = vmatprep.subr.bf16.mxu1 %v766_v23 }
  0xa4   :  { %714 = vmatpush3.bf16.msra.mxu0 %v800_v3 }
  0xa5   :  { %715 = vmatprep.subr.bf16.mxu0 %v801_v4 }
  0xa6   :  { %413 = vmatpush1.bf16.msra.mxu1 %v768_v24 }
  0xa7   :  { %414 = vmatprep.subr.bf16.mxu1 %v769_v25 }
  0xa8   :  { %716 = vmatpush3.bf16.msra.mxu0 %v802_v5 }
  0xaa   :  { %415 = vmatpush1.bf16.msra.mxu1 %v771_v26 }
  0xab   :  { %416 = vmatprep.subr.bf16.mxu1 %v772_v27 }
  0xae   :  { %417 = vmatpush1.bf16.msra.mxu1 %v774_v28 }
  0xaf   :  { %418 = vmatprep.subr.bf16.mxu1 %v775_v29 }
  0xb2   :  { %419 = vmatpush1.bf16.msra.mxu1 %v777_v30 }
  0xb3   :  { %420 = vmatprep.subr.bf16.mxu1 %v778_v31 }
  0xb6   :  { %421 = vmatpush1.bf16.msra.mxu1 %v780_v32 }
  0xb7   :  { %422 = vmatprep.subr.bf16.mxu1 %v781_v33 }
  0xba   :  { %423 = vmatpush1.bf16.msra.mxu1 %v783_v34 }
  0xbb   :  { %424 = vmatprep.subr.bf16.mxu1 %v784_v35 }
  0xbe   :  { %425 = vmatpush1.bf16.msra.mxu1 %v786_v36 }
 0x156   :  { %v179_v52 = vpop.f32.mrb[0].mxu0 }
 0x157   :  { %v180_v53 = vadd.f32 %v179_v52, %v124_v50  ;;  %v181_v54 = vpop.f32.mrb[1].mxu0 }
 0x158   :  { %v182_v55 = vadd.f32 %v181_v54, %v128_v51  ;;  %v183_v56 = vpop.f32.mrb[2].mxu0 }
 0x159   :  { %803 = vtanh.f32 %v180_v53  ;;  %v184_v57 = vpop.f32.mrb[3].mxu0 }
 0x15a   :  { %805 = vtanh.f32 %v182_v55 }
 0x163   :  { %v804_v58 = vpop.eup %803 }
 0x164   :  { %v806_v59 = vpop.eup %805  ;;  %v188_v61 = vpack.c.bf16 %v804_v58, %v804_v58 }
 0x165   :  { %v189_v60 = vpack.c.bf16 %v806_v59, %v806_v59 }
 0x167   :  { %426 = vmatprep.mubr.bf16.mxu1 %v189_v60 }
 0x168   :  { %427 = vmatmul.mubr.bf16.vlgmr.msra.gmra.mrb[0].mxu1 %v188_v61 }
 0x23b   :  { %v428_v9 = vpop.f32.mrb[0].mxu1 }
 0x23c   :  { %v429_v10 = vadd.f32 %v428_v9, %v227_v7  ;;  %v430_v11 = vpop.f32.mrb[1].mxu1 }
 0x23d   :  { %v431_v12 = vadd.f32 %v430_v11, %v231_v8  ;;  %v432_v13 = vpop.f32.mrb[2].mxu1 }
 0x23e   :  { %807 = vtanh.f32 %v429_v10  ;;  %v433_v14 = vpop.f32.mrb[3].mxu1 }
 0x23f   :  { %809 = vtanh.f32 %v431_v12 }
 0x248   :  { %v808_v15 = vpop.eup %807 }
 0x249   :  { %v810_v16 = vpop.eup %809  ;;  %v437_v18 = vpack.c.bf16 %v808_v15, %v808_v15 }
 0x24a   :  { %v438_v17 = vpack.c.bf16 %v810_v16, %v810_v16 }
 0x24c   :  { %606 = vmatprep.mubr.bf16.mxu0 %v438_v17 }
 0x24d   :  { %607 = vmatmul.mubr.bf16.vlgmr.msra.gmra.mrb[4].mxu0 %v437_v18 }
 0x320   :  { %v717_v20 = vpop.f32.mrb[4].mxu0 }
 0x321   :  { %v718_v21 = vpop.f32.mrb[5].mxu0 }
 0x322   :  { %v719_v23 = vadd.f32 %v718_v21, %v717_v20  ;;  %v720_v24 = vpop.f32.mrb[6].mxu0 }
 0x323   :  { %v721_v25 = vpop.f32.mrb[7].mxu0 }
 0x324   :  { %v609_v26 = vadd.f32 %v719_v23, %v684_v22 }
 0x326   :  { %v617_v27 = vsel %vm616_vm1, %v609_v26, -1e+30  ;;  %v628_v28 = vsel %vm627_vm2, %v609_v26, 0.0 }
 0x327   :  { %618 = vmax.xlane.f32.xlu0 %v617_v27 }
 0x3b4   :  { %v619_v29 = vpop.xlane.xlu0 %618 }
 0x3b5   :  { %v620_v30 = vsub.f32 %v617_v27, %v619_v29 }
 0x3b7   :  { %v621_v31 = vmul.f32 1.442695, %v620_v30 }
 0x3b9   :  { %811 = vpow2.f32 %v621_v31 }
 0x3c3   :  { %v812_v32 = vpop.eup %811 }
 0x3c4   :  { %623 = vadd.xlane.f32.xlu0 %v812_v32 }
 0x451   :  { %v624_v33 = vpop.xlane.xlu0 %623 }
 0x452   :  { %813 = vrcp.f32 %v624_v33 }
 0x45c   :  { %v814_v34 = vpop.eup %813 }
 0x45d   :  { %v626_v35 = vmul.f32 %v814_v34, %v812_v32 }
 0x45f   :  { %v629_v36 = vsel %vm616_vm1, %v626_v35, %v628_v28 }
 0x460   :  { %630 = vst [vmem:[#allocation14] sm:$0xff] %v629_v36 }
 0x461   :  { %980 = shalt.err (!%p977_p4)
}
 0x462   :  { %s981_s11 = scalar_lea.hbm %s1159_s7, 128 }
 0x463   :  { %p982_p5 = scmp.ne.s32.totalorder %s1159_s7, %s981_s11  ;;  %p985_p6 = scmp.lt.u32.totalorder %s981_s11, %s1159_s7 }
 0x465   :  { %p987_p7 = pnand %p985_p6, %p982_p5 }
 0x467   :  { %990 = shalt.err (!%p987_p7)
}
 0x468   :  { %640 = dma.vmem_to_hbm [thread:$0]  %s638_s13, 128, %s1159_s7, [#allocation4]  }
 0x469   :  { %999 = dma.done.wait [#allocation4], 128  }
 0x46a   :  { %1000 = vsyncadd [#allocation4], 4294967168 }
 0x46b   :  { %644 = vsyncpa [#allocation3], 1 }
 0x46c   :  { %645 = vsyncpa [#allocation6], 1 }
 0x46d   :  { %646 = vsyncpa [#allocation9], 1 }
 0x46e   :  { %647 = vsyncpa [#allocation12], 1 }
 0x46f   :  { %648 = vsyncpa [#allocation4], 1 }

</bundles_post_ra>
